<compile_context>
chip_gen: v5e
topology: v5e:2x2
jax: 0.10.0
libtpu: 0.0.40
codegen_flags: <defaults>
</compile_context>

<pallas_src>
import functools

import jax
import jax.numpy as jnp
import numpy as np
from jax.experimental import pallas as pl
from jax.experimental.pallas import tpu as pltpu

# ---------------- small, module-consistent configuration ----------------
B = 2                  # batch
V = 16                 # vocabulary_size (sequence length / conv height)
E = 32                 # embedding_dim (conv width)
FILTER_NUM = 4         # filter_num
FILTER_SIZES = (2, 3, 4)

R = max(FILTER_SIZES)                 # im2col window rows -> K = R*E = 128
K = R * E
NF = len(FILTER_SIZES) * FILTER_NUM   # 12 conv output columns
NC = 2 * NF                           # + 12 duplicated attention-context cols
AUX_ROWS = 4 + V


def textcnn_kernel(xu_ref, wf_ref, aux_ref, bfc_ref, out_ref, *, TB, V, NF):
    """TextCNN forward (inference path) for one tile of TB sequences."""
    NC = 2 * NF
    # One fused MXU pass: conv1 + all three size-l convolutions + the attention
    # context.  K = 128 (exact fit on v5e's 128x128 MXU), N = 24.  The im2col
    # operand arrives pre-built and pre-cast to bf16 from the wrapper.
    y = jnp.dot(xu_ref[...], wf_ref[...], preferred_element_type=jnp.float32)
    y = y.reshape(TB, V, NC)

    aux = aux_ref[...]                                        # (4+V, NC) f32
    bias_row = aux[0, :].reshape(1, 1, NC)        # conv biases | folded ctx biases
    blin_row = aux[1, :NF].reshape(1, NF)         # Linear(V-l+1,1) biases (dup F)
    wfc_row = aux[2, :NF].reshape(1, NF)          # fc weight
    w0_row = aux[3, :NF].reshape(1, 1, NF)        # att weight on the conv value
    w_lin = aux[4:4 + V, :NF].reshape(1, V, NF)   # Linear(V-l+1,1) weights, 0-padded

    y = y + bias_row
    conv_relu = jnp.maximum(y[:, :, :NF], 0.0)                # (TB, V, NF)
    ctx = y[:, :, NF:]                                        # batt already folded in
    atten = jax.nn.sigmoid(conv_relu * w0_row + ctx)          # attention gate
    gated = conv_relu * atten        # redundant ReLU dropped: both factors >= 0

    # All three Linear(V-l+1, 1) layers as one fused reduction over positions.
    # NOTE: positions i >= V-l+1 see zero-padded x rows (finite garbage in
    # conv/ctx) and are masked purely by zero rows in w_lin -- do not remove
    # the zero padding in the wrapper or the zero rows in pack_params.
    feats = jnp.maximum(jnp.sum(gated * w_lin, axis=1) + blin_row, 0.0)   # (TB, NF)

    # TODO(synk): nn.Dropout is identity in eval/inference mode; no RNG dropout here.
    logit = jnp.sum(feats * wfc_row, axis=1, keepdims=True) + bfc_ref[0]  # (TB, 1)
    out_ref[...] = jax.nn.sigmoid(logit)


def init_params(key):
    """Deterministic synthetic parameters with the shapes implied by __init__."""
    def take(shape, scale=0.1):
        nonlocal key
        key, sub = jax.random.split(key)
        return scale * jax.random.normal(sub, shape, dtype=jnp.float32)

    params = {
        "w1": take((E, 3)),            # conv1 weight (3,1,1,E) stored transposed
        "b1": take((1, 3)),
        "per_size": [],
        "wfc": take((len(FILTER_SIZES) * FILTER_NUM, 1)),
        "bfc": take((1, 1)),
    }
    for l in FILTER_SIZES:
        L = V - l + 1
        params["per_size"].append(dict(
            wconv=take((l * E, FILTER_NUM)),   # Conv2d(1,F,(l,E)) weight, flattened^T
            bconv=take((1, FILTER_NUM)),
            watt=take((1, 3 * l + 1)),         # Linear(3l+1, 1) weight
            batt=take((1, 1)),
            wlin=take((L, 1)),                 # Linear(V-l+1, 1) weight^T
            blin=take((1, 1)),
        ))
    return params


def pack_params(params):
    """One-time host-side packing into the fused kernel layout (3 operands)."""
    F = FILTER_NUM

    wf = jnp.zeros((K, NC), jnp.float32)        # fused conv + context weights
    bias_row = jnp.zeros((NC,), jnp.float32)
    w0_row = jnp.zeros((NF,), jnp.float32)
    blin_row = jnp.zeros((NF,), jnp.float32)
    w_lin = jnp.zeros((V, NF), jnp.float32)

    for s, (l, p) in enumerate(zip(FILTER_SIZES, params["per_size"])):
        L = V - l + 1
        c0 = s * F
        # Conv2d(1, F, (l, E)) weight, rows flattened as r*E + e (matches im2col).
        wf = wf.at[:l * E, c0:c0 + F].set(p["wconv"])
        bias_row = bias_row.at[c0:c0 + F].set(p["bconv"][0])
        # Attention-context column: ctx_w[r*E+e] = sum_ch w1[e,ch]*watt[1+ch*l+r];
        # the conv1-bias part and the attention bias are folded into bias_row.
        # Columns are duplicated across the F filters (the PyTorch code
        # concatenates F copies of the same window) -> no in-kernel lane repeat.
        watt_mat = p["watt"][0, 1:].reshape(3, l)                  # [ch, r]
        ctx_col = (params["w1"] @ watt_mat).T.reshape(l * E, 1)    # rows r*E + e
        ctx_bias = jnp.sum(watt_mat * params["b1"][0][:, None]) + p["batt"][0, 0]
        wf = wf.at[:l * E, NF + c0:NF + c0 + F].set(
            jnp.broadcast_to(ctx_col, (l * E, F)))
        bias_row = bias_row.at[NF + c0:NF + c0 + F].set(ctx_bias)
        # Attention weight on the conv value, Linear(L,1) bias and weights.
        w0_row = w0_row.at[c0:c0 + F].set(p["watt"][0, 0])
        blin_row = blin_row.at[c0:c0 + F].set(p["blin"][0, 0])
        w_lin = w_lin.at[:L, c0:c0 + F].set(jnp.broadcast_to(p["wlin"], (L, F)))

    aux = jnp.zeros((AUX_ROWS, NC), jnp.float32)
    aux = aux.at[0, :].set(bias_row)
    aux = aux.at[1, :NF].set(blin_row)
    aux = aux.at[2, :NF].set(params["wfc"][:, 0])
    aux = aux.at[3, :NF].set(w0_row)
    aux = aux.at[4:4 + V, :NF].set(w_lin)

    return {"wf": wf.astype(jnp.bfloat16),      # bf16 only touches the MXU
            "aux": aux,                          # f32 element-wise parameters
            "bfc": params["bfc"].reshape(1)}     # true scalar -> SMEM


@jax.jit
def textcnn_forward(x_nchw, wf, aux, bfc):
    x_bve = x_nchw[:, 0, :, :]                                # (B, V, E) f32
    # Hoisted im2col + bf16 cast (perf review): XLA fuses the pad / shifted
    # slices / concat into one cheap transform, the kernel becomes a single
    # matmul plus a few VPU ops, and the activation DMA is half-size.
    x_pad = jnp.pad(x_bve, ((0, 0), (0, R - 1), (0, 0)))      # (B, V+R-1, E)
    xu = jnp.concatenate([x_pad[:, r:r + V, :] for r in range(R)], axis=-1)
    xu = xu.reshape(B * V, K).astype(jnp.bfloat16)            # (B*V, 128) bf16

    TB = B   # sequences per grid step; one tile covers the demo batch (grid=1).
    # TODO(synk): for large B pick TB so TB*V is a few hundred rows (multiple of
    # 16 bf16 sublanes), lane-pack the (B, 1) output, and keep the "parallel"
    # axis so v7x's two TensorCores split the batch; wf/aux stay unblocked
    # (~6 KB, trivially inside every generation's scoped-VMEM budget).
    kernel = functools.partial(textcnn_kernel, TB=TB, V=V, NF=NF)
    return pl.pallas_call(
        kernel,
        out_shape=jax.ShapeDtypeStruct((B, 1), jnp.float32),
        grid=(B // TB,),
        in_specs=[
            pl.BlockSpec((TB * V, K), lambda i: (i, 0)),         # activations (bf16)
            pl.BlockSpec((K, NC), lambda i: (0, 0)),             # fused weights (bf16)
            pl.BlockSpec((AUX_ROWS, NC), lambda i: (0, 0)),      # f32 aux slab
            pl.BlockSpec(memory_space=pltpu.MemorySpace.SMEM),   # fc bias scalar
        ],
        out_specs=pl.BlockSpec((TB, 1), lambda i: (i, 0)),
        compiler_params=pltpu.CompilerParams(
            dimension_semantics=("parallel",)),
    )(xu, wf, aux, bfc)


def textcnn_reference(x_nchw, params):
    """Pure-JAX f32 mirror of the PyTorch forward (inference branch)."""
    x_bve = x_nchw[:, 0, :, :]
    conv1_out = (x_bve.reshape(B * V, E) @ params["w1"]).reshape(B, V, 3)
    conv1_out = conv1_out + params["b1"].reshape(1, 1, 3)
    feats = []
    for l, p in zip(FILTER_SIZES, params["per_size"]):
        L = V - l + 1
        xunf = jnp.concatenate([x_bve[:, r:r + L, :] for r in range(l)], axis=-1)
        conv = (xunf.reshape(B * L, l * E) @ p["wconv"]).reshape(B, L, FILTER_NUM)
        conv_relu = jnp.maximum(conv + p["bconv"].reshape(1, 1, FILTER_NUM), 0.0)
        # conv1 window, flattened exactly as conv1[:,:,i:i+l,:].reshape(-1,1,1,3l)
        c1win = jnp.stack(
            [conv1_out[:, i:i + l, :].transpose(0, 2, 1).reshape(B, 3 * l)
             for i in range(L)], axis=1)                       # (B, L, 3l)
        ctx = jnp.einsum("blk,k->bl", c1win, p["watt"][0, 1:])
        logit = p["watt"][0, 0] * conv_relu + ctx[:, :, None] + p["batt"][0, 0]
        gated = jnp.maximum(conv_relu * jax.nn.sigmoid(logit), 0.0)
        lin = jnp.einsum("blf,l->bf", gated, p["wlin"][:, 0]) + p["blin"][0, 0]
        feats.append(jnp.maximum(lin, 0.0))
    feat = jnp.concatenate(feats, axis=1)
    return jax.nn.sigmoid(feat @ params["wfc"] + params["bfc"][0, 0])


if __name__ == "__main__":
    key = jax.random.PRNGKey(0)
    k_x, k_p = jax.random.split(key)
    # PyTorch NCHW input: (batch, 1, vocabulary_size, embedding_dim)
    x = jax.random.normal(k_x, (B, 1, V, E), dtype=jnp.float32)
    params = init_params(k_p)
    packed = pack_params(params)

    out = textcnn_forward(x, packed["wf"], packed["aux"], packed["bfc"])
    out = jax.block_until_ready(out)

    ref = textcnn_reference(x, params)
    # bf16 MXU operands mean ~2^-8 relative error on the pre-sigmoid logits;
    # the sigmoid-squashed output comfortably meets 5e-3.  Keep ctx columns /
    # activations in f32 if intermediate logits are ever consumed directly.
    np.testing.assert_allclose(np.asarray(out), np.asarray(ref),
                               rtol=5e-3, atol=5e-3)
    print("KERNEL_OK")
</pallas_src>

<mosaic_0001>
module attributes {stable_mosaic.version = 11 : i64} {
  func.func @textcnn_kernel(%arg0: i32, %arg1: memref<32x128xbf16, #tpu.memory_space<vmem>>, %arg2: memref<128x24xbf16, #tpu.memory_space<vmem>>, %arg3: memref<20x24xf32, #tpu.memory_space<vmem>>, %arg4: memref<1xf32, #tpu.memory_space<smem>>, %arg5: memref<2x1xf32, #tpu.memory_space<vmem>>) attributes {dimension_semantics = [#tpu.dimension_semantics<parallel>], iteration_bounds = array<i64: 1>, scalar_prefetch = 0 : i64, scratch_operands = 0 : i64, tpu.core_type = #tpu.core_type<tc>, window_params = [{transform_indices = @transform_0, window_bounds = array<i64: 32, 128>}, {pipeline_mode = #tpu.pipeline_mode<synchronous>, transform_indices = @transform_1, window_bounds = array<i64: 128, 24>}, {pipeline_mode = #tpu.pipeline_mode<synchronous>, transform_indices = @transform_2, window_bounds = array<i64: 20, 24>}, {transform_indices = @transform_3, window_bounds = array<i64: 1>}, {transform_indices = @transform_4, window_bounds = array<i64: 2, 1>}]} {
    %c0 = arith.constant 0 : index
    %c0_0 = arith.constant 0 : index
    %0 = vector.load %arg1[%c0, %c0_0] : memref<32x128xbf16, #tpu.memory_space<vmem>>, vector<32x128xbf16>
    %c0_1 = arith.constant 0 : index
    %c0_2 = arith.constant 0 : index
    %1 = vector.load %arg2[%c0_1, %c0_2] : memref<128x24xbf16, #tpu.memory_space<vmem>>, vector<128x24xbf16>
    %cst = arith.constant dense<0.000000e+00> : vector<32x24xf32>
    %2 = tpu.matmul %0, %1, %cst {dimension_numbers = #tpu.dot_dimension_numbers<[1], [0], [0], [1], [0, 0, 1, 1], [], []>} : vector<32x128xbf16>, vector<128x24xbf16>, vector<32x24xf32> -> vector<32x24xf32>
    %3 = vector.shape_cast %2 : vector<32x24xf32> to vector<2x16x24xf32>
    %c0_3 = arith.constant 0 : index
    %c0_4 = arith.constant 0 : index
    %4 = vector.load %arg3[%c0_3, %c0_4] : memref<20x24xf32, #tpu.memory_space<vmem>>, vector<20x24xf32>
    %5 = vector.extract_strided_slice %4 {offsets = [0, 0], sizes = [1, 24], strides = [1, 1]} : vector<20x24xf32> to vector<1x24xf32>
    %6 = vector.shape_cast %5 : vector<1x24xf32> to vector<24xf32>
    %7 = vector.shape_cast %6 : vector<24xf32> to vector<1x1x24xf32>
    %8 = vector.extract_strided_slice %4 {offsets = [1, 0], sizes = [1, 12], strides = [1, 1]} : vector<20x24xf32> to vector<1x12xf32>
    %9 = vector.shape_cast %8 : vector<1x12xf32> to vector<12xf32>
    %10 = vector.shape_cast %9 : vector<12xf32> to vector<1x12xf32>
    %11 = vector.extract_strided_slice %4 {offsets = [2, 0], sizes = [1, 12], strides = [1, 1]} : vector<20x24xf32> to vector<1x12xf32>
    %12 = vector.shape_cast %11 : vector<1x12xf32> to vector<12xf32>
    %13 = vector.shape_cast %12 : vector<12xf32> to vector<1x12xf32>
    %14 = vector.extract_strided_slice %4 {offsets = [3, 0], sizes = [1, 12], strides = [1, 1]} : vector<20x24xf32> to vector<1x12xf32>
    %15 = vector.shape_cast %14 : vector<1x12xf32> to vector<12xf32>
    %16 = vector.shape_cast %15 : vector<12xf32> to vector<1x1x12xf32>
    %17 = vector.extract_strided_slice %4 {offsets = [4, 0], sizes = [16, 12], strides = [1, 1]} : vector<20x24xf32> to vector<16x12xf32>
    %18 = vector.shape_cast %17 : vector<16x12xf32> to vector<1x16x12xf32>
    %19 = vector.broadcast %7 : vector<1x1x24xf32> to vector<2x16x24xf32>
    %20 = arith.addf %3, %19 : vector<2x16x24xf32>
    %21 = vector.extract_strided_slice %20 {offsets = [0, 0, 0], sizes = [2, 16, 12], strides = [1, 1, 1]} : vector<2x16x24xf32> to vector<2x16x12xf32>
    %cst_5 = arith.constant 0.000000e+00 : f32
    %22 = vector.broadcast %cst_5 : f32 to vector<2x16x12xf32>
    %23 = arith.maximumf %21, %22 : vector<2x16x12xf32>
    %24 = vector.extract_strided_slice %20 {offsets = [0, 0, 12], sizes = [2, 16, 12], strides = [1, 1, 1]} : vector<2x16x24xf32> to vector<2x16x12xf32>
    %25 = vector.broadcast %16 : vector<1x1x12xf32> to vector<2x16x12xf32>
    %26 = arith.mulf %23, %25 : vector<2x16x12xf32>
    %27 = arith.addf %26, %24 : vector<2x16x12xf32>
    %28 = arith.negf %27 : vector<2x16x12xf32>
    %29 = math.exp %28 : vector<2x16x12xf32>
    %cst_6 = arith.constant 1.000000e+00 : f32
    %30 = vector.broadcast %cst_6 : f32 to vector<2x16x12xf32>
    %31 = arith.addf %30, %29 : vector<2x16x12xf32>
    %32 = arith.divf %30, %31 : vector<2x16x12xf32>
    %33 = arith.mulf %23, %32 : vector<2x16x12xf32>
    %34 = vector.broadcast %18 : vector<1x16x12xf32> to vector<2x16x12xf32>
    %35 = arith.mulf %33, %34 : vector<2x16x12xf32>
    %cst_7 = arith.constant dense<0.000000e+00> : vector<2x12xf32>
    %36 = vector.multi_reduction <add>, %35, %cst_7 [1] : vector<2x16x12xf32> to vector<2x12xf32>
    %37 = vector.broadcast %10 : vector<1x12xf32> to vector<2x12xf32>
    %38 = arith.addf %36, %37 : vector<2x12xf32>
    %cst_8 = arith.constant 0.000000e+00 : f32
    %39 = vector.broadcast %cst_8 : f32 to vector<2x12xf32>
    %40 = arith.maximumf %38, %39 : vector<2x12xf32>
    %41 = vector.broadcast %13 : vector<1x12xf32> to vector<2x12xf32>
    %42 = arith.mulf %40, %41 : vector<2x12xf32>
    %cst_9 = arith.constant dense<0.000000e+00> : vector<2xf32>
    %43 = vector.multi_reduction <add>, %42, %cst_9 [1] : vector<2x12xf32> to vector<2xf32>
    %44 = vector.shape_cast %43 : vector<2xf32> to vector<2x1xf32>
    %c0_10 = arith.constant 0 : index
    %45 = memref.load %arg4[%c0_10] : memref<1xf32, #tpu.memory_space<smem>>
    %46 = vector.broadcast %45 : f32 to vector<2x1xf32>
    %47 = arith.addf %44, %46 : vector<2x1xf32>
    %48 = arith.negf %47 : vector<2x1xf32>
    %49 = math.exp %48 : vector<2x1xf32>
    %cst_11 = arith.constant 1.000000e+00 : f32
    %50 = vector.broadcast %cst_11 : f32 to vector<2x1xf32>
    %51 = arith.addf %50, %49 : vector<2x1xf32>
    %52 = arith.divf %50, %51 : vector<2x1xf32>
    %c0_12 = arith.constant 0 : index
    %c0_13 = arith.constant 0 : index
    %53 = vector.load %arg5[%c0_12, %c0_13] : memref<2x1xf32, #tpu.memory_space<vmem>>, vector<2x1xf32>
    tpu.vector_store %arg5[%c0_12, %c0_13], %52 {strides = array<i32>} : memref<2x1xf32, #tpu.memory_space<vmem>>, vector<2x1xf32>,
    return
  }
  func.func @transform_0(%arg0: i32) -> (i32, i32) {
    %c0_i32 = arith.constant 0 : i32
    %c0_i32_0 = arith.constant 0 : i32
    return %arg0, %c0_i32 : i32, i32
  }
  func.func @transform_1(%arg0: i32) -> (i32, i32) {
    %c0_i32 = arith.constant 0 : i32
    %c0_i32_0 = arith.constant 0 : i32
    %c0_i32_1 = arith.constant 0 : i32
    return %c0_i32, %c0_i32_0 : i32, i32
  }
  func.func @transform_2(%arg0: i32) -> (i32, i32) {
    %c0_i32 = arith.constant 0 : i32
    %c0_i32_0 = arith.constant 0 : i32
    %c0_i32_1 = arith.constant 0 : i32
    return %c0_i32, %c0_i32_0 : i32, i32
  }
  func.func @transform_3(%arg0: i32) -> i32 {
    %c0_i32 = arith.constant 0 : i32
    %c0_i32_0 = arith.constant 0 : i32
    return %c0_i32 : i32
  }
  func.func @transform_4(%arg0: i32) -> (i32, i32) {
    %c0_i32 = arith.constant 0 : i32
    %c0_i32_0 = arith.constant 0 : i32
    return %arg0, %c0_i32 : i32, i32
  }
}

</mosaic_0001>

<bundles_post_ra>
// kernel: textcnn_forward.1
= control target key start
LH: loop header
LB: loop body
LE: loop exit
PB: predicated region body
PF: predicated region fallthrough
CT: control target
= control target key end

     0   :  { %vm237_vm3 = vcmask 1043456   ;;  %s524_s1 = inlined_call_operand.vmem [shape: bf16[128,24], index: 1, kind: input, shape index: {}]   ;;  %s525_s0 = inlined_call_operand.vmem [shape: bf16[32,128], index: 0, kind: input, shape index: {}]   ;;  %s526_s2 = inlined_call_operand.vmem [shape: f32[20,24], index: 2, kind: input, shape index: {}]   ;;  %s527_s3 = inlined_call_operand.<no memory space> [shape: f32[1], index: 3, kind: input, shape index: {}]   ;;  %s528_s4 = inlined_call_operand.vmem [shape: f32[2,1], index: 4, kind: output, shape index: {}]  }
   0x1   :  { %v368_v0 = vld [vmem:[%s524_s1 + $0x38] sm:$0xff]  ;;  %v367_v1 = vld [vmem:[%s524_s1 + $0x30] sm:$0xff]  ;;  %v366_v2 = vld [vmem:[%s524_s1 + $0x28] sm:$0xff] }
   0x2   :  { %98 = vmatpush.bf16.msra.mxu0 %v368_v0  ;;  %369 = vmatpush.bf16.msra.mxu1 %v368_v0  ;;  %v365_v3 = vld [vmem:[%s524_s1 + $0x20] sm:$0xff]  ;;  %v364_v4 = vld [vmem:[%s524_s1 + $0x18] sm:$0xff]  ;;  %v363_v5 = vld [vmem:[%s524_s1 + $0x10] sm:$0xff] }
   0x3   :  { %v362_v6 = vld [vmem:[%s524_s1 + $0x8] sm:$0xff]  ;;  %v361_v7 = vld [vmem:[%s524_s1] sm:$0xff]  ;;  %s398_s1 = smov 116  }
   0x4   :  { %v359_v8 = vld [vmem:[%s525_s0] sm:$0xff]  ;;  %v360_v9 = vld [vmem:[%s525_s0 + $0x8] sm:$0xff] }
   0x5   :  { %v457_v10 = vld [vmem:[%s526_s2] sm:$0xff]  ;;  %v118_v52 = vld [vmem:[%s526_s2 + $0x8] sm:$0xff] }
   0x6   :  { %99 = vmatpush.bf16.msra.mxu0 %v367_v1  ;;  %370 = vmatpush.bf16.msra.mxu1 %v367_v1  ;;  %v120_v11 = vperm.slane %v457_v10, 0  ;;  %v129_v22 = vperm.slane %v457_v10, 3  ;;  %v238_v55 = vrot.slane %v457_v10, 4  ;;  %v239_v61 = vrot.slane %v118_v52, 4 }
   0xa   :  { %100 = vmatpush.bf16.msra.mxu0 %v366_v2  ;;  %371 = vmatpush.bf16.msra.mxu1 %v366_v2 }
   0xe   :  { %101 = vmatpush.bf16.msra.mxu0 %v365_v3  ;;  %372 = vmatpush.bf16.msra.mxu1 %v365_v3 }
  0x12   :  { %102 = vmatpush.bf16.msra.mxu0 %v364_v4  ;;  %373 = vmatpush.bf16.msra.mxu1 %v364_v4 }
  0x16   :  { %103 = vmatpush.bf16.msra.mxu0 %v363_v5  ;;  %374 = vmatpush.bf16.msra.mxu1 %v363_v5 }
  0x1a   :  { %104 = vmatpush.bf16.msra.mxu0 %v362_v6  ;;  %375 = vmatpush.bf16.msra.mxu1 %v362_v6 }
  0x1e   :  { %105 = vmatpush.bf16.msra.mxu0 %v361_v7  ;;  %376 = vmatpush.bf16.msra.mxu1 %v361_v7 }
  0x21   :  { %106 = vmatmul.bf16.vlgmr.msra.gmra.mxu0 %v359_v8  ;;  %111 = vmatmul.bf16.vlgmr.msra.gmra.mxu1 %v360_v9  ;;  %v240_v9 = vsel %vm237_vm3, %v238_v55, %v239_v61 }
  0x9e   :  { %v107_v12 = vpop.f32.mrf.mxu0  ;;  %v112_v13 = vpop.f32.mrf.mxu1 }
  0x9f   :  { %v460_v14 = vadd.f32 %v120_v11, %v107_v12  ;;  %v462_v15 = vadd.f32 %v120_v11, %v112_v13  ;;  %v119_v12 = vld [vmem:[%s526_s2 + $0x10] sm:$0xf] }
  0xa1   :  { %142 = vrot.lane.b32.xlu0 %v462_v15, %s398_s1  ;;  %138 = vrot.lane.b32.xlu1 %v460_v14, %s398_s1  ;;  %v125_v20 = vmax.f32 %v460_v14, 0.0  ;;  %v127_v21 = vmax.f32 %v462_v15, 0.0 }
  0xa3   :  { %v132_v23 = vmul.f32 %v129_v22, %v127_v21  ;;  %v130_v24 = vmul.f32 %v129_v22, %v125_v20 }
  0xa6   :  { %v109_v16 = vpop.f32.mrf.mxu0  ;;  %v114_v17 = vpop.f32.mrf.mxu1 }
  0xa7   :  { %v466_v18 = vadd.f32 %v120_v11, %v109_v16  ;;  %v468_v19 = vadd.f32 %v120_v11, %v114_v17 }
  0xa9   :  { %144 = vrot.lane.b32.xlu0 %v468_v19, %s398_s1  ;;  %140 = vrot.lane.b32.xlu1 %v466_v18, %s398_s1  ;;  %v126_v29 = vmax.f32 %v466_v18, 0.0  ;;  %v128_v30 = vmax.f32 %v468_v19, 0.0 }
  0xab   :  { %v133_v33 = vmul.f32 %v129_v22, %v128_v30  ;;  %v131_v34 = vmul.f32 %v129_v22, %v126_v29 }
 0x113   :  { %v143_v25 = vpop.permute.xlu0 %142  ;;  %v139_v26 = vpop.permute.xlu1 %138 }
 0x114   :  { %v152_v27 = vadd.f32 %v143_v25, %v132_v23  ;;  %v150_v28 = vadd.f32 %v139_v26, %v130_v24 }
 0x116   :  { %v356_v31 = vmul.f32 -1.442695, %v152_v27  ;;  %v354_v32 = vmul.f32 -1.442695, %v150_v28  ;;  %v241_v28 = vrot.slane %v119_v12, 4 }
 0x118   :  { %378 = vpow2.f32 %v356_v31 }
 0x119   :  { %380 = vpow2.f32 %v354_v32 }
 0x11b   :  { %v145_v35 = vpop.permute.xlu0 %144  ;;  %v141_v36 = vpop.permute.xlu1 %140 }
 0x11c   :  { %v153_v37 = vadd.f32 %v145_v35, %v133_v33  ;;  %v151_v38 = vadd.f32 %v141_v36, %v131_v34 }
 0x11e   :  { %v379_v39 = vpop.eup %378  ;;  %v357_v40 = vmul.f32 -1.442695, %v153_v37  ;;  %v355_v43 = vmul.f32 -1.442695, %v151_v38  ;;  %v242_v37 = vsel %vm237_vm3, %v239_v61, %v241_v28  ;;  %vm282_vm3 = vcmask 91136  }
 0x11f   :  { %v381_v41 = vpop.eup %380  ;;  %v168_v42 = vadd.f32 1.0, %v379_v39 }
 0x120   :  { %v166_v44 = vadd.f32 1.0, %v381_v41  ;;  %382 = vpow2.f32 %v357_v40 }
 0x121   :  { %384 = vrcp.f32 %v168_v42  ;;  %v209_v56 = vand.u32 2147483647, %v168_v42  ;;  %v211_v57 = vand.u32 2147483648, %v168_v42  ;;  %vm205_vm2 = vweird.f32 %v168_v42 }
 0x122   :  { %386 = vrcp.f32 %v166_v44  ;;  %v181_v60 = vand.u32 2147483648, %v166_v44  ;;  %v179_v63 = vand.u32 2147483647, %v166_v44  ;;  %vm175_vm5 = vweird.f32 %v166_v44 }
 0x123   :  { %388 = vpow2.f32 %v355_v43  ;;  %v212_v2 = vor.u32 1.1754944e-38, %v211_v57  ;;  %vm210_vm6 = vcmp.eq.f32.partialorder %v209_v56, 8.507059e+37  ;;  %v268_v57 = vperm.slane %v457_v10, 1 }
 0x124   :  { %v182_v5 = vor.u32 1.1754944e-38, %v181_v60  ;;  %vm180_vm8 = vcmp.eq.f32.partialorder %v179_v63, 8.507059e+37  ;;  %v273_v60 = vperm.slane %v457_v10, 2 }
 0x126   :  { %v383_v45 = vpop.eup %382 }
 0x127   :  { %v385_v46 = vpop.eup %384  ;;  %v485_v47 = vadd.f32 1.0, %v383_v45 }
 0x128   :  { %v387_v48 = vpop.eup %386  ;;  %v201_v49 = vmul.f32 %v385_v46, %v168_v42  ;;  %vm206_vm0 = vweird.f32 %v385_v46 }
 0x129   :  { %v389_v50 = vpop.eup %388  ;;  %v171_v51 = vmul.f32 %v387_v48, %v166_v44  ;;  %390 = vrcp.f32 %v485_v47  ;;  %vm176_vm1 = vweird.f32 %v387_v48  ;;  %vm207_vm4 = vmor %vm205_vm2, %vm206_vm0  ;;  %v226_v23 = vand.u32 2147483648, %v485_v47 }
 0x12a   :  { %v202_v53 = vsub.f32 1.0, %v201_v49  ;;  %v491_v54 = vadd.f32 1.0, %v389_v50  ;;  %vm177_vm7 = vmor %vm175_vm5, %vm176_vm1  ;;  %v224_v26 = vand.u32 2147483647, %v485_v47  ;;  %vm220_vm10 = vweird.f32 %v485_v47 }
 0x12b   :  { %v172_v58 = vsub.f32 1.0, %v171_v51  ;;  %v227_v14 = vor.u32 1.1754944e-38, %v226_v23  ;;  %vm249_vm1 = vcmask 97280   ;;  %vm279_vm2 = vcmask 1041409  }
 0x12c   :  { %v203_v59 = vmul.f32 %v385_v46, %v202_v53  ;;  %392 = vrcp.f32 %v491_v54  ;;  %v196_v15 = vand.u32 2147483648, %v491_v54  ;;  %vm225_vm13 = vcmp.eq.f32.partialorder %v224_v26, 8.507059e+37 }
 0x12d   :  { %v173_v62 = vmul.f32 %v387_v48, %v172_v58  ;;  %vm190_vm14 = vweird.f32 %v491_v54 }
 0x12e   :  { %v204_v0 = vadd.f32 %v385_v46, %v203_v59  ;;  %v197_v39 = vor.u32 1.1754944e-38, %v196_v15 }
 0x12f   :  { %v391_v1 = vpop.eup %390  ;;  %v174_v3 = vadd.f32 %v387_v48, %v173_v62 }
 0x130   :  { %v208_v4 = vsel %vm207_vm4, %v385_v46, %v204_v0  ;;  %v216_v6 = vmul.f32 %v391_v1, %v485_v47  ;;  %vm221_vm9 = vweird.f32 %v391_v1 }
 0x131   :  { %v213_v7 = vsel %vm210_vm6, %v212_v2, %v208_v4  ;;  %v178_v8 = vsel %vm177_vm7, %v387_v48, %v174_v3  ;;  %vm222_vm11 = vmor %vm220_vm10, %vm221_vm9  ;;  %vm308_vm6 = vcmask 1024  }
 0x132   :  { %v393_v11 = vpop.eup %392  ;;  %v232_v13 = vmul.f32 %v213_v7, %v127_v21  ;;  %v183_v16 = vsel %vm180_vm8, %v182_v5, %v178_v8  ;;  %v217_v17 = vsub.f32 1.0, %v216_v6  ;;  %v194_v21 = vand.u32 2147483647, %v491_v54 }
 0x133   :  { %v230_v22 = vmul.f32 %v183_v16, %v125_v20  ;;  %v186_v24 = vmul.f32 %v393_v11, %v491_v54  ;;  %vm191_vm12 = vweird.f32 %v393_v11  ;;  %v287_v6 = vstv %s527_s3 }
 0x134   :  { %v218_v25 = vmul.f32 %v391_v1, %v217_v17  ;;  %v247_v27 = vmul.f32 %v240_v9, %v232_v13  ;;  %vm192_vm15 = vmor %vm190_vm14, %vm191_vm12  ;;  %vm195_vm0 = vcmp.eq.f32.partialorder %v194_v21, 8.507059e+37 }
 0x135   :  { %v187_v31 = vsub.f32 1.0, %v186_v24  ;;  %v245_v32 = vmul.f32 %v240_v9, %v230_v22 }
 0x136   :  { %v219_v33 = vadd.f32 %v391_v1, %v218_v25  ;;  %v259_v44 = vsel %vm249_vm1, %v247_v27, 0.0 }
 0x137   :  { %v188_v20 = vmul.f32 %v393_v11, %v187_v31  ;;  %v250_v48 = vsel %vm249_vm1, %v245_v32, 0.0 }
 0x138   :  { %v223_v34 = vsel %vm222_vm11, %v391_v1, %v219_v33 }
 0x139   :  { %v228_v35 = vsel %vm225_vm13, %v227_v14, %v223_v34  ;;  %v189_v36 = vadd.f32 %v393_v11, %v188_v20 }
 0x13a   :  { %v233_v38 = vmul.f32 %v228_v35, %v128_v30 }
 0x13b   :  { %v193_v40 = vsel %vm192_vm15, %v393_v11, %v189_v36 }
 0x13c   :  { %v198_v41 = vsel %vm195_vm0, %v197_v39, %v193_v40  ;;  %v248_v42 = vmul.f32 %v242_v37, %v233_v38 }
 0x13d   :  { %v231_v43 = vmul.f32 %v198_v41, %v126_v29 }
 0x13e   :  { %v260_v45 = vsel %vm249_vm1, %v248_v42, 0.0 }
 0x13f   :  { %v246_v46 = vmul.f32 %v242_v37, %v231_v43  ;;  %v261_v47 = vadd.f32 %v260_v45, %v259_v44 }
 0x141   :  { %v251_v49 = vsel %vm249_vm1, %v246_v46, 0.0  ;;  %v262_v50 = vrot.slane %v261_v47, 4 }
 0x142   :  { %v252_v51 = vadd.f32 %v251_v49, %v250_v48 }
 0x143   :  { %v263_v19 = vadd.f32 %v262_v50, %v261_v47 }
 0x144   :  { %v253_v30 = vrot.slane %v252_v51, 4 }
 0x145   :  { %v264_v52 = vrot.slane %v263_v19, 2 }
 0x146   :  { %v254_v53 = vadd.f32 %v253_v30, %v252_v51 }
 0x147   :  { %v265_v54 = vadd.f32 %v264_v52, %v263_v19 }
 0x148   :  { %v255_v55 = vrot.slane %v254_v53, 2 }
 0x149   :  { %v266_v56 = vrot.slane %v265_v54, 1 }
 0x14a   :  { %v256_v58 = vadd.f32 %v255_v55, %v254_v53 }
 0x14b   :  { %v267_v18 = vadd.f32 %v266_v56, %v265_v54 }
 0x14c   :  { %v257_v29 = vrot.slane %v256_v58, 1 }
 0x14d   :  { %v270_v59 = vadd.f32 %v268_v57, %v267_v18 }
 0x14e   :  { %v258_v61 = vadd.f32 %v257_v29, %v256_v58 }
 0x14f   :  { %v272_v62 = vmax.f32 %v270_v59, 0.0 }
 0x150   :  { %v269_v63 = vadd.f32 %v268_v57, %v258_v61 }
 0x151   :  { %v275_v0 = vmul.f32 %v273_v60, %v272_v62 }
 0x152   :  { %v271_v1 = vmax.f32 %v269_v63, 0.0 }
 0x153   :  { %v278_v2 = vrot.slane %v275_v0, 7 }
 0x154   :  { %v274_v3 = vmul.f32 %v273_v60, %v271_v1 }
 0x156   :  { %v280_v4 = vsel %vm279_vm2, %v278_v2, %v274_v3 }
 0x157   :  { %v283_v5 = vsel %vm282_vm3, %v280_v4, 0.0 }
 0x158   :  { %284 = vadd.xlane.f32.xlu2 %v283_v5 }
 0x1cb   :  { %v285_v7 = vpop.xlane.xlu2 %284 }
 0x1cc   :  { %v288_v8 = vadd.f32 %v287_v6, %v285_v7 }
 0x1ce   :  { %v358_v9 = vmul.f32 -1.442695, %v288_v8 }
 0x1d0   :  { %394 = vpow2.f32 %v358_v9 }
 0x1d6   :  { %v395_v10 = vpop.eup %394 }
 0x1d7   :  { %v292_v11 = vadd.f32 1.0, %v395_v10 }
 0x1d9   :  { %396 = vrcp.f32 %v292_v11  ;;  %v304_v17 = vand.u32 2147483648, %v292_v11  ;;  %v302_v23 = vand.u32 2147483647, %v292_v11  ;;  %vm298_vm5 = vweird.f32 %v292_v11 }
 0x1db   :  { %v305_v25 = vor.u32 1.1754944e-38, %v304_v17  ;;  %vm303_vm8 = vcmp.eq.f32.partialorder %v302_v23, 8.507059e+37 }
 0x1df   :  { %v397_v12 = vpop.eup %396 }
 0x1e0   :  { %v294_v13 = vmul.f32 %v397_v12, %v292_v11  ;;  %vm299_vm4 = vweird.f32 %v397_v12 }
 0x1e1   :  { %vm300_vm7 = vmor %vm298_vm5, %vm299_vm4 }
 0x1e2   :  { %v295_v16 = vsub.f32 1.0, %v294_v13 }
 0x1e4   :  { %v296_v22 = vmul.f32 %v397_v12, %v295_v16 }
 0x1e6   :  { %v297_v24 = vadd.f32 %v397_v12, %v296_v22 }
 0x1e8   :  { %v301_v26 = vsel %vm300_vm7, %v397_v12, %v297_v24 }
 0x1e9   :  { %v306_v27 = vsel %vm303_vm8, %v305_v25, %v301_v26 }
 0x1ea   :  { %309 = vst.msk [vmem:[%s528_s4] sm:$0x3] %vm308_vm6, %v306_v27 }

</bundles_post_ra>
